<compile_context>
chip_gen: v7x
topology: tpu7x:2x2x1
jax: 0.10.0
libtpu: 0.0.40
codegen_flags: <defaults>
</compile_context>

<pallas_src>
import functools

import jax
import jax.numpy as jnp
from jax import lax
from jax.experimental import pallas as pl
from jax.experimental.pallas import tpu as pltpu

# Defaults from ProcessMappingLoss.__init__ (no learned parameters).
NODE_LOSS_WEIGHT = 1.0
EDGE_LOSS_WEIGHT = 0.5
FLOW_LOSS_WEIGHT = 0.1
EPS = 1e-12          # F.normalize default eps
CLAMP_MAX = 10.0

_NUM_CORES = 2                            # v7x: 2 TCs/chip; harmless on v5e/v6e
_STREAM_VMEM_BUDGET = 16 * 1024 * 1024    # double-buffered streaming blocks
_FLOW_VMEM_BUDGET = 8 * 1024 * 1024       # finalize-pass flow blocks


def _round_up(x, m):
    return (x + m - 1) // m * m


def _padded_lanes(n):
    # Mosaic pads the minor (lane) dim of VMEM blocks to multiples of 128.
    return _round_up(max(int(n), 1), 128)


def _pick_tile(n_rows, per_row_bytes, budget):
    """Rows per tile given the *lane-padded* per-row VMEM cost of all buffers."""
    t = max(8, (budget // per_row_bytes) // 8 * 8)
    return max(8, min(t, _round_up(n_rows, 8)))


def _row_normalize(x):
    # == x / max(||x||_2, EPS):  sqrt(max(s, eps^2)) == max(sqrt(s), eps).
    ss = jnp.sum(x * x, axis=1, keepdims=True)
    return x * lax.rsqrt(jnp.maximum(ss, EPS * EPS))


# ---------------------------------------------------------------------------
# Kernel 1: node stream — accumulate sum((normalize(pred) - normalize(tgt))^2)
# Grid: (core, tile).  Per-core VMEM vector accumulator, per-core sums row.
# ---------------------------------------------------------------------------
def _node_kernel(pred_ref, tgt_ref, sums_ref, acc_ref, *, n_rows, tile, tpc):
    c = pl.program_id(0)
    i = pl.program_id(1)

    @pl.when(i == 0)
    def _init():
        acc_ref[...] = jnp.zeros_like(acc_ref)

    # One mask per step, reused for pred and target (padded / OOB rows -> 0).
    row0 = (c * tpc + i) * tile
    rows = lax.broadcasted_iota(jnp.int32, pred_ref.shape, 0) + row0
    valid = rows < n_rows

    p = _row_normalize(jnp.where(valid, pred_ref[...].astype(jnp.float32), 0.0))
    t = _row_normalize(jnp.where(valid, tgt_ref[...].astype(jnp.float32), 0.0))
    d = p - t
    # Per-lane partial sums: pure VPU adds, no per-step cross-lane reduce.
    acc_ref[...] += jnp.sum(d * d, axis=0, keepdims=True)

    @pl.when(i == tpc - 1)
    def _fin():
        total = jnp.sum(acc_ref[...], axis=1, keepdims=True)          # (1, 1)
        sums_ref[...] = jnp.zeros(sums_ref.shape, jnp.float32) + total


# ---------------------------------------------------------------------------
# Kernel 2: edge stream — accumulate MSE numerator + flow-column sum-of-squares
# and emit the row-normalized flow columns (padded rows are exactly 0).
# ---------------------------------------------------------------------------
def _edge_kernel(pred_ref, tgt_ref, sums_ref, pf_ref, tf_ref,
                 acc_mse_ref, acc_pf_ref, acc_tf_ref, *, n_rows, tile, tpc):
    c = pl.program_id(0)
    i = pl.program_id(1)

    @pl.when(i == 0)
    def _init():
        acc_mse_ref[...] = jnp.zeros_like(acc_mse_ref)
        acc_pf_ref[...] = jnp.zeros_like(acc_pf_ref)
        acc_tf_ref[...] = jnp.zeros_like(acc_tf_ref)

    row0 = (c * tpc + i) * tile
    rows = lax.broadcasted_iota(jnp.int32, pred_ref.shape, 0) + row0
    valid = rows < n_rows

    p = _row_normalize(jnp.where(valid, pred_ref[...].astype(jnp.float32), 0.0))
    t = _row_normalize(jnp.where(valid, tgt_ref[...].astype(jnp.float32), 0.0))
    d = p - t
    acc_mse_ref[...] += jnp.sum(d * d, axis=0, keepdims=True)          # (1, F)

    pf = p[:, 0:1]       # (tile, 1) row-normalized flow column (pred)
    tf = t[:, 0:1]
    acc_pf_ref[...] += jnp.sum(pf * pf, axis=0, keepdims=True)         # (1, 1)
    acc_tf_ref[...] += jnp.sum(tf * tf, axis=0, keepdims=True)
    pf_ref[...] = pf
    tf_ref[...] = tf

    @pl.when(i == tpc - 1)
    def _fin():
        mse = jnp.sum(acc_mse_ref[...], axis=1, keepdims=True)         # (1, 1)
        spf = acc_pf_ref[...]
        stf = acc_tf_ref[...]
        lane = lax.broadcasted_iota(jnp.int32, sums_ref.shape, 1)
        sums_ref[...] = jnp.where(
            lane == 0, mse,
            jnp.where(lane == 1, spf,
                      jnp.where(lane == 2, stf, 0.0)))


# ---------------------------------------------------------------------------
# Kernel 3: streaming finalize — dim=0 flow normalization + L1 mean, clamping,
# weighting.  Gridded over lane-dense (rows, tile) flow slabs (no VMEM cliff).
# ---------------------------------------------------------------------------
def _finalize_kernel(node_sums_ref, edge_sums_ref, pf_ref, tf_ref, out_ref,
                     facc_ref, *, total_rows, rb, node_count, edge_count,
                     n_edges):
    i = pl.program_id(0)

    @pl.when(i == 0)
    def _init():
        facc_ref[0] = 0.0

    pf_ss = edge_sums_ref[0, 1] + edge_sums_ref[8, 1]
    tf_ss = edge_sums_ref[0, 2] + edge_sums_ref[8, 2]
    inv_p = lax.rsqrt(jnp.maximum(pf_ss, EPS * EPS))
    inv_t = lax.rsqrt(jnp.maximum(tf_ss, EPS * EPS))

    rows = lax.broadcasted_iota(jnp.int32, pf_ref.shape, 0) + i * rb
    diff = jnp.abs(pf_ref[...] * inv_p - tf_ref[...] * inv_t)
    diff = jnp.where(rows < total_rows, diff, 0.0)
    facc_ref[0] += jnp.sum(diff)

    @pl.when(i == pl.num_programs(0) - 1)
    def _fin():
        node_sum = node_sums_ref[0, 0] + node_sums_ref[8, 0]
        edge_sum = edge_sums_ref[0, 0] + edge_sums_ref[8, 0]
        node_loss = jnp.minimum(node_sum / node_count, CLAMP_MAX)
        edge_loss = jnp.minimum(edge_sum / edge_count, CLAMP_MAX)
        flow_loss = jnp.minimum(facc_ref[0] / n_edges, CLAMP_MAX)
        total = (NODE_LOSS_WEIGHT * node_loss + EDGE_LOSS_WEIGHT * edge_loss
                 + FLOW_LOSS_WEIGHT * flow_loss)
        lane = lax.broadcasted_iota(jnp.int32, out_ref.shape, 1)
        out_ref[...] = jnp.where(
            lane == 0, node_loss,
            jnp.where(lane == 1, edge_loss,
                      jnp.where(lane == 2, flow_loss,
                                jnp.where(lane == 3, total, 0.0))))


# ---------------------------------------------------------------------------
# pallas_call wrappers
# ---------------------------------------------------------------------------
def _node_call(pred, tgt):
    n_rows, n_feat = pred.shape
    itemsize = pred.dtype.itemsize
    # 2 inputs x 2 pipeline buffers, lane-padded.
    per_row = 2 * 2 * _padded_lanes(n_feat) * itemsize
    tile = _pick_tile(n_rows, per_row, _STREAM_VMEM_BUDGET)
    num_tiles = -(-n_rows // tile)
    tpc = -(-num_tiles // _NUM_CORES)          # tiles per core
    last_blk = num_tiles - 1

    def in_map(c, i):
        return (jnp.minimum(c * tpc + i, last_blk), 0)

    kernel = functools.partial(_node_kernel, n_rows=n_rows, tile=tile, tpc=tpc)
    vmem_limit = int(min(max(per_row * tile + (4 << 20), 20 << 20), 48 << 20))
    bytes_in = 2 * n_rows * n_feat * itemsize
    return pl.pallas_call(
        kernel,
        grid=(_NUM_CORES, tpc),
        in_specs=[pl.BlockSpec((tile, n_feat), in_map),
                  pl.BlockSpec((tile, n_feat), in_map)],
        out_specs=pl.BlockSpec((8, 128), lambda c, i: (c, 0)),
        out_shape=jax.ShapeDtypeStruct((8 * _NUM_CORES, 128), jnp.float32),
        scratch_shapes=[pltpu.VMEM((1, n_feat), jnp.float32)],
        compiler_params=pltpu.CompilerParams(
            dimension_semantics=("parallel", "arbitrary"),
            vmem_limit_bytes=vmem_limit),
        cost_estimate=pl.CostEstimate(flops=10 * n_rows * n_feat,
                                      transcendentals=2 * n_rows,
                                      bytes_accessed=bytes_in + 8192),
    )(pred, tgt)


def _edge_call(pred, tgt):
    n_rows, n_feat = pred.shape
    itemsize = pred.dtype.itemsize
    # 2 inputs + 2 lane-padded (tile, 1) column outputs, all double-buffered.
    per_row = (2 * _padded_lanes(n_feat) * itemsize + 2 * 128 * 4) * 2
    tile = _pick_tile(n_rows, per_row, _STREAM_VMEM_BUDGET)
    num_tiles = -(-n_rows // tile)
    tpc = -(-num_tiles // _NUM_CORES)
    last_blk = num_tiles - 1
    e_pad = _NUM_CORES * tpc * tile

    def in_map(c, i):
        return (jnp.minimum(c * tpc + i, last_blk), 0)

    def col_map(c, i):
        return (c * tpc + i, 0)

    kernel = functools.partial(_edge_kernel, n_rows=n_rows, tile=tile, tpc=tpc)
    vmem_limit = int(min(max(per_row * tile + (4 << 20), 20 << 20), 48 << 20))
    bytes_in = 2 * n_rows * n_feat * itemsize
    sums, pf, tf = pl.pallas_call(
        kernel,
        grid=(_NUM_CORES, tpc),
        in_specs=[pl.BlockSpec((tile, n_feat), in_map),
                  pl.BlockSpec((tile, n_feat), in_map)],
        out_specs=(pl.BlockSpec((8, 128), lambda c, i: (c, 0)),
                   pl.BlockSpec((tile, 1), col_map),
                   pl.BlockSpec((tile, 1), col_map)),
        out_shape=(jax.ShapeDtypeStruct((8 * _NUM_CORES, 128), jnp.float32),
                   jax.ShapeDtypeStruct((e_pad, 1), jnp.float32),
                   jax.ShapeDtypeStruct((e_pad, 1), jnp.float32)),
        scratch_shapes=[pltpu.VMEM((1, n_feat), jnp.float32),
                        pltpu.VMEM((1, 1), jnp.float32),
                        pltpu.VMEM((1, 1), jnp.float32)],
        compiler_params=pltpu.CompilerParams(
            dimension_semantics=("parallel", "arbitrary"),
            vmem_limit_bytes=vmem_limit),
        cost_estimate=pl.CostEstimate(flops=10 * n_rows * n_feat + 6 * n_rows,
                                      transcendentals=2 * n_rows,
                                      bytes_accessed=bytes_in + 8 * e_pad + 8192),
    )(pred, tgt)
    # Free metadata reshape of the contiguous column arrays into lane-dense
    # (rows, tile) slabs for the streaming finalize pass.
    rows = e_pad // tile
    return sums, pf.reshape(rows, tile), tf.reshape(rows, tile)


def _finalize_call(node_sums, edge_sums, pf2, tf2, *, node_count, edge_count,
                   n_edges):
    rows, cols = pf2.shape
    per_row = 2 * 2 * cols * 4                 # 2 arrays x 2 pipeline buffers
    max_rb = max(8, (_FLOW_VMEM_BUDGET // per_row) // 8 * 8)
    rb = rows if rows <= max_rb else max_rb
    grid_f = -(-rows // rb)
    kernel = functools.partial(
        _finalize_kernel, total_rows=rows, rb=rb,
        node_count=float(node_count), edge_count=float(edge_count),
        n_edges=float(n_edges))
    vmem_limit = int(min(max(per_row * rb + (4 << 20), 20 << 20), 48 << 20))
    return pl.pallas_call(
        kernel,
        grid=(grid_f,),
        in_specs=[pl.BlockSpec(memory_space=pltpu.MemorySpace.SMEM),
                  pl.BlockSpec(memory_space=pltpu.MemorySpace.SMEM),
                  pl.BlockSpec((rb, cols), lambda i: (i, 0)),
                  pl.BlockSpec((rb, cols), lambda i: (i, 0))],
        out_specs=pl.BlockSpec((8, 128), lambda i: (0, 0)),
        out_shape=jax.ShapeDtypeStruct((8, 128), jnp.float32),
        scratch_shapes=[pltpu.SMEM((1,), jnp.float32)],
        compiler_params=pltpu.CompilerParams(
            dimension_semantics=("arbitrary",),
            vmem_limit_bytes=vmem_limit),
        cost_estimate=pl.CostEstimate(flops=4 * rows * cols + 64,
                                      transcendentals=2,
                                      bytes_accessed=8 * rows * cols + 16384),
    )(node_sums, edge_sums, pf2, tf2)


@jax.jit
def _process_mapping_loss_impl(node_pred, edge_pred, node_target, edge_target):
    node_sums = _node_call(node_pred, node_target)
    edge_sums, pf2, tf2 = _edge_call(edge_pred, edge_target)
    n_nodes, n_feat = node_pred.shape
    n_edges, n_feat_e = edge_pred.shape
    out = _finalize_call(node_sums, edge_sums, pf2, tf2,
                         node_count=n_nodes * n_feat,
                         edge_count=n_edges * n_feat_e,
                         n_edges=n_edges)
    return out[0, 0:4]   # (node_loss, edge_loss, flow_loss, total_loss)


def process_mapping_loss(node_pred, edge_pred, graph_emb, node_target,
                         edge_target, batch=None):
    """JAX/Pallas equivalent of ProcessMappingLoss.forward (forward pass only).

    graph_emb and batch are accepted for signature parity but (as in the
    reference PyTorch forward) are never used.  Loss components are returned
    as device scalars — no .item()/float() host syncs.
    """
    del graph_emb, batch  # unused by the reference forward
    losses = _process_mapping_loss_impl(node_pred, edge_pred, node_target,
                                        edge_target)
    total_loss = losses[3]
    loss_components = {
        "node_loss": losses[0],
        "edge_loss": losses[1],
        "flow_loss": losses[2],
        "total_loss": losses[3],
    }
    return total_loss, loss_components


# ---------------------------------------------------------------------------
# Pure-JAX reference (mirrors the PyTorch forward exactly) + demo
# ---------------------------------------------------------------------------
def _reference(node_pred, edge_pred, node_target, edge_target):
    def rn_rows(x):
        return x / jnp.maximum(jnp.linalg.norm(x, axis=1, keepdims=True), EPS)

    np_n, nt_n = rn_rows(node_pred), rn_rows(node_target)
    ep_n, et_n = rn_rows(edge_pred), rn_rows(edge_target)
    nl = jnp.minimum(jnp.mean((np_n - nt_n) ** 2), CLAMP_MAX)
    el = jnp.minimum(jnp.mean((ep_n - et_n) ** 2), CLAMP_MAX)
    pf = ep_n[:, 0]
    tf = et_n[:, 0]
    pf = pf / jnp.maximum(jnp.linalg.norm(pf), EPS)
    tf = tf / jnp.maximum(jnp.linalg.norm(tf), EPS)
    fl = jnp.minimum(jnp.mean(jnp.abs(pf - tf)), CLAMP_MAX)
    total = NODE_LOSS_WEIGHT * nl + EDGE_LOSS_WEIGHT * el + FLOW_LOSS_WEIGHT * fl
    return total, nl, el, fl


if __name__ == "__main__":
    key = jax.random.PRNGKey(0)
    k_np, k_nt, k_ep, k_et, k_g = jax.random.split(key, 5)

    # Small shapes consistent with the module (N nodes, E edges, feature dims).
    N, F = 8, 32
    E, F_EDGE = 8, 32
    B, H = 2, 32

    node_pred = jax.random.normal(k_np, (N, F), dtype=jnp.float32)
    node_target = jax.random.normal(k_nt, (N, F), dtype=jnp.float32)
    edge_pred = jax.random.normal(k_ep, (E, F_EDGE), dtype=jnp.float32)
    edge_target = jax.random.normal(k_et, (E, F_EDGE), dtype=jnp.float32)
    graph_emb = jax.random.normal(k_g, (B, H), dtype=jnp.float32)

    total_loss, comps = process_mapping_loss(
        node_pred, edge_pred, graph_emb, node_target, edge_target, batch=None)
    jax.block_until_ready(total_loss)

    ref_total, ref_nl, ref_el, ref_fl = _reference(
        node_pred, edge_pred, node_target, edge_target)
    assert jnp.allclose(total_loss, ref_total, rtol=1e-4, atol=1e-5), (
        float(total_loss), float(ref_total))
    assert jnp.allclose(comps["node_loss"], ref_nl, rtol=1e-4, atol=1e-5)
    assert jnp.allclose(comps["edge_loss"], ref_el, rtol=1e-4, atol=1e-5)
    assert jnp.allclose(comps["flow_loss"], ref_fl, rtol=1e-4, atol=1e-5)

    # Second check: multi-tile grid, partial/fully-masked tiles, clamped
    # out-of-range blocks, both "core" rows of the parallel axis doing work,
    # and the streaming finalize path.
    keys = jax.random.split(jax.random.PRNGKey(1), 4)
    N2, F2, E2, FE2 = 20000, 32, 13000, 48
    np2 = jax.random.normal(keys[0], (N2, F2), dtype=jnp.float32)
    nt2 = jax.random.normal(keys[1], (N2, F2), dtype=jnp.float32)
    ep2 = jax.random.normal(keys[2], (E2, FE2), dtype=jnp.float32)
    et2 = jax.random.normal(keys[3], (E2, FE2), dtype=jnp.float32)
    total2, comps2 = process_mapping_loss(np2, ep2, graph_emb, nt2, et2)
    jax.block_until_ready(total2)
    ref2_total, ref2_nl, ref2_el, ref2_fl = _reference(np2, ep2, nt2, et2)
    assert jnp.allclose(total2, ref2_total, rtol=1e-4, atol=1e-5), (
        float(total2), float(ref2_total))
    assert jnp.allclose(comps2["node_loss"], ref2_nl, rtol=1e-4, atol=1e-5)
    assert jnp.allclose(comps2["edge_loss"], ref2_el, rtol=1e-4, atol=1e-5)
    assert jnp.allclose(comps2["flow_loss"], ref2_fl, rtol=1e-4, atol=1e-5)

    print("KERNEL_OK")
</pallas_src>

<mosaic_0001>
module attributes {stable_mosaic.version = 11 : i64} {
  func.func @_edge_kernel(%arg0: i32, %arg1: i32, %arg2: memref<8x32xf32, #tpu.memory_space<vmem>>, %arg3: memref<8x32xf32, #tpu.memory_space<vmem>>, %arg4: memref<8x128xf32, #tpu.memory_space<vmem>>, %arg5: memref<8x1xf32, #tpu.memory_space<vmem>>, %arg6: memref<8x1xf32, #tpu.memory_space<vmem>>, %arg7: memref<1x32xf32, #tpu.memory_space<vmem>>, %arg8: memref<1x1xf32, #tpu.memory_space<vmem>>, %arg9: memref<1x1xf32, #tpu.memory_space<vmem>>) attributes {dimension_semantics = [#tpu.dimension_semantics<parallel>, #tpu.dimension_semantics<arbitrary>], iteration_bounds = array<i64: 2, 1>, scalar_prefetch = 0 : i64, scratch_operands = 3 : i64, tpu.core_type = #tpu.core_type<tc>, window_params = [{transform_indices = @transform_0, window_bounds = array<i64: 8, 32>}, {transform_indices = @transform_1, window_bounds = array<i64: 8, 32>}, {transform_indices = @transform_2, window_bounds = array<i64: 8, 128>}, {transform_indices = @transform_3, window_bounds = array<i64: 8, 1>}, {transform_indices = @transform_4, window_bounds = array<i64: 8, 1>}]} {
    %c0_i32 = arith.constant 0 : i32
    %0 = arith.cmpi eq, %arg1, %c0_i32 : i32
    %1 = arith.extui %0 : i1 to i32
    %c0_i32_0 = arith.constant 0 : i32
    %2 = arith.cmpi ne, %1, %c0_i32_0 : i32
    scf.if %2 {
      %cst_31 = arith.constant 0.000000e+00 : f32
      %59 = vector.broadcast %cst_31 : f32 to vector<1x32xf32>
      %c0_32 = arith.constant 0 : index
      %c0_33 = arith.constant 0 : index
      %60 = vector.load %arg7[%c0_32, %c0_33] : memref<1x32xf32, #tpu.memory_space<vmem>>, vector<1x32xf32>
      tpu.vector_store %arg7[%c0_32, %c0_33], %59 {strides = array<i32>} : memref<1x32xf32, #tpu.memory_space<vmem>>, vector<1x32xf32>,
      %cst_34 = arith.constant 0.000000e+00 : f32
      %61 = vector.broadcast %cst_34 : f32 to vector<1x1xf32>
      %c0_35 = arith.constant 0 : index
      %c0_36 = arith.constant 0 : index
      %62 = vector.load %arg8[%c0_35, %c0_36] : memref<1x1xf32, #tpu.memory_space<vmem>>, vector<1x1xf32>
      tpu.vector_store %arg8[%c0_35, %c0_36], %61 {strides = array<i32>} : memref<1x1xf32, #tpu.memory_space<vmem>>, vector<1x1xf32>,
      %cst_37 = arith.constant 0.000000e+00 : f32
      %63 = vector.broadcast %cst_37 : f32 to vector<1x1xf32>
      %c0_38 = arith.constant 0 : index
      %c0_39 = arith.constant 0 : index
      %64 = vector.load %arg9[%c0_38, %c0_39] : memref<1x1xf32, #tpu.memory_space<vmem>>, vector<1x1xf32>
      tpu.vector_store %arg9[%c0_38, %c0_39], %63 {strides = array<i32>} : memref<1x1xf32, #tpu.memory_space<vmem>>, vector<1x1xf32>,
    } else {
    }
    %c1_i32 = arith.constant 1 : i32
    %3 = arith.muli %arg0, %c1_i32 : i32
    %4 = arith.addi %3, %arg1 : i32
    %c8_i32 = arith.constant 8 : i32
    %5 = arith.muli %4, %c8_i32 : i32
    %6 = tpu.iota {dimensions = array<i32: 0>} : vector<8x32xi32>
    %7 = vector.broadcast %5 : i32 to vector<8x32xi32>
    %8 = arith.addi %6, %7 : vector<8x32xi32>
    %c8_i32_1 = arith.constant 8 : i32
    %9 = vector.broadcast %c8_i32_1 : i32 to vector<8x32xi32>
    %10 = arith.cmpi slt, %8, %9 : vector<8x32xi32>
    %c0 = arith.constant 0 : index
    %c0_2 = arith.constant 0 : index
    %11 = vector.load %arg2[%c0, %c0_2] : memref<8x32xf32, #tpu.memory_space<vmem>>, vector<8x32xf32>
    %cst = arith.constant 0.000000e+00 : f32
    %12 = vector.broadcast %cst : f32 to vector<8x32xf32>
    %13 = arith.select %10, %11, %12 : vector<8x32xi1>, vector<8x32xf32>
    %14 = arith.mulf %13, %13 : vector<8x32xf32>
    %cst_3 = arith.constant dense<0.000000e+00> : vector<8xf32>
    %15 = vector.multi_reduction <add>, %14, %cst_3 [1] : vector<8x32xf32> to vector<8xf32>
    %16 = vector.shape_cast %15 : vector<8xf32> to vector<8x1xf32>
    %cst_4 = arith.constant 1.000000e-24 : f32
    %17 = vector.broadcast %cst_4 : f32 to vector<8x1xf32>
    %18 = arith.maximumf %16, %17 : vector<8x1xf32>
    %19 = math.rsqrt %18 : vector<8x1xf32>
    %20 = vector.broadcast %19 : vector<8x1xf32> to vector<8x32xf32>
    %21 = arith.mulf %13, %20 : vector<8x32xf32>
    %c0_5 = arith.constant 0 : index
    %c0_6 = arith.constant 0 : index
    %22 = vector.load %arg3[%c0_5, %c0_6] : memref<8x32xf32, #tpu.memory_space<vmem>>, vector<8x32xf32>
    %cst_7 = arith.constant 0.000000e+00 : f32
    %23 = vector.broadcast %cst_7 : f32 to vector<8x32xf32>
    %24 = arith.select %10, %22, %23 : vector<8x32xi1>, vector<8x32xf32>
    %25 = arith.mulf %24, %24 : vector<8x32xf32>
    %cst_8 = arith.constant dense<0.000000e+00> : vector<8xf32>
    %26 = vector.multi_reduction <add>, %25, %cst_8 [1] : vector<8x32xf32> to vector<8xf32>
    %27 = vector.shape_cast %26 : vector<8xf32> to vector<8x1xf32>
    %cst_9 = arith.constant 1.000000e-24 : f32
    %28 = vector.broadcast %cst_9 : f32 to vector<8x1xf32>
    %29 = arith.maximumf %27, %28 : vector<8x1xf32>
    %30 = math.rsqrt %29 : vector<8x1xf32>
    %31 = vector.broadcast %30 : vector<8x1xf32> to vector<8x32xf32>
    %32 = arith.mulf %24, %31 : vector<8x32xf32>
    %33 = arith.subf %21, %32 : vector<8x32xf32>
    %c0_10 = arith.constant 0 : index
    %c0_11 = arith.constant 0 : index
    %34 = vector.load %arg7[%c0_10, %c0_11] : memref<1x32xf32, #tpu.memory_space<vmem>>, vector<1x32xf32>
    %35 = arith.mulf %33, %33 : vector<8x32xf32>
    %cst_12 = arith.constant dense<0.000000e+00> : vector<32xf32>
    %36 = vector.multi_reduction <add>, %35, %cst_12 [0] : vector<8x32xf32> to vector<32xf32>
    %37 = vector.shape_cast %36 : vector<32xf32> to vector<1x32xf32>
    %38 = arith.addf %34, %37 : vector<1x32xf32>
    %c0_13 = arith.constant 0 : index
    %c0_14 = arith.constant 0 : index
    %39 = vector.load %arg7[%c0_13, %c0_14] : memref<1x32xf32, #tpu.memory_space<vmem>>, vector<1x32xf32>
    tpu.vector_store %arg7[%c0_13, %c0_14], %38 {strides = array<i32>} : memref<1x32xf32, #tpu.memory_space<vmem>>, vector<1x32xf32>,
    %40 = vector.extract_strided_slice %21 {offsets = [0, 0], sizes = [8, 1], strides = [1, 1]} : vector<8x32xf32> to vector<8x1xf32>
    %41 = vector.extract_strided_slice %32 {offsets = [0, 0], sizes = [8, 1], strides = [1, 1]} : vector<8x32xf32> to vector<8x1xf32>
    %c0_15 = arith.constant 0 : index
    %c0_16 = arith.constant 0 : index
    %42 = vector.load %arg8[%c0_15, %c0_16] : memref<1x1xf32, #tpu.memory_space<vmem>>, vector<1x1xf32>
    %43 = arith.mulf %40, %40 : vector<8x1xf32>
    %cst_17 = arith.constant dense<0.000000e+00> : vector<1xf32>
    %44 = vector.multi_reduction <add>, %43, %cst_17 [0] : vector<8x1xf32> to vector<1xf32>
    %45 = vector.shape_cast %44 : vector<1xf32> to vector<1x1xf32>
    %46 = arith.addf %42, %45 : vector<1x1xf32>
    %c0_18 = arith.constant 0 : index
    %c0_19 = arith.constant 0 : index
    %47 = vector.load %arg8[%c0_18, %c0_19] : memref<1x1xf32, #tpu.memory_space<vmem>>, vector<1x1xf32>
    tpu.vector_store %arg8[%c0_18, %c0_19], %46 {strides = array<i32>} : memref<1x1xf32, #tpu.memory_space<vmem>>, vector<1x1xf32>,
    %c0_20 = arith.constant 0 : index
    %c0_21 = arith.constant 0 : index
    %48 = vector.load %arg9[%c0_20, %c0_21] : memref<1x1xf32, #tpu.memory_space<vmem>>, vector<1x1xf32>
    %49 = arith.mulf %41, %41 : vector<8x1xf32>
    %cst_22 = arith.constant dense<0.000000e+00> : vector<1xf32>
    %50 = vector.multi_reduction <add>, %49, %cst_22 [0] : vector<8x1xf32> to vector<1xf32>
    %51 = vector.shape_cast %50 : vector<1xf32> to vector<1x1xf32>
    %52 = arith.addf %48, %51 : vector<1x1xf32>
    %c0_23 = arith.constant 0 : index
    %c0_24 = arith.constant 0 : index
    %53 = vector.load %arg9[%c0_23, %c0_24] : memref<1x1xf32, #tpu.memory_space<vmem>>, vector<1x1xf32>
    tpu.vector_store %arg9[%c0_23, %c0_24], %52 {strides = array<i32>} : memref<1x1xf32, #tpu.memory_space<vmem>>, vector<1x1xf32>,
    %c0_25 = arith.constant 0 : index
    %c0_26 = arith.constant 0 : index
    %54 = vector.load %arg5[%c0_25, %c0_26] : memref<8x1xf32, #tpu.memory_space<vmem>>, vector<8x1xf32>
    tpu.vector_store %arg5[%c0_25, %c0_26], %40 {strides = array<i32>} : memref<8x1xf32, #tpu.memory_space<vmem>>, vector<8x1xf32>,
    %c0_27 = arith.constant 0 : index
    %c0_28 = arith.constant 0 : index
    %55 = vector.load %arg6[%c0_27, %c0_28] : memref<8x1xf32, #tpu.memory_space<vmem>>, vector<8x1xf32>
    tpu.vector_store %arg6[%c0_27, %c0_28], %41 {strides = array<i32>} : memref<8x1xf32, #tpu.memory_space<vmem>>, vector<8x1xf32>,
    %c0_i32_29 = arith.constant 0 : i32
    %56 = arith.cmpi eq, %arg1, %c0_i32_29 : i32
    %57 = arith.extui %56 : i1 to i32
    %c0_i32_30 = arith.constant 0 : i32
    %58 = arith.cmpi ne, %57, %c0_i32_30 : i32
    scf.if %58 {
      %c0_31 = arith.constant 0 : index
      %c0_32 = arith.constant 0 : index
      %59 = vector.load %arg7[%c0_31, %c0_32] : memref<1x32xf32, #tpu.memory_space<vmem>>, vector<1x32xf32>
      %cst_33 = arith.constant dense<0.000000e+00> : vector<1xf32>
      %60 = vector.multi_reduction <add>, %59, %cst_33 [1] : vector<1x32xf32> to vector<1xf32>
      %61 = vector.shape_cast %60 : vector<1xf32> to vector<1x1xf32>
      %c0_34 = arith.constant 0 : index
      %c0_35 = arith.constant 0 : index
      %62 = vector.load %arg8[%c0_34, %c0_35] : memref<1x1xf32, #tpu.memory_space<vmem>>, vector<1x1xf32>
      %c0_36 = arith.constant 0 : index
      %c0_37 = arith.constant 0 : index
      %63 = vector.load %arg9[%c0_36, %c0_37] : memref<1x1xf32, #tpu.memory_space<vmem>>, vector<1x1xf32>
      %64 = tpu.iota {dimensions = array<i32: 1>} : vector<8x128xi32>
      %c0_i32_38 = arith.constant 0 : i32
      %65 = vector.broadcast %c0_i32_38 : i32 to vector<8x128xi32>
      %66 = arith.cmpi eq, %64, %65 : vector<8x128xi32>
      %c1_i32_39 = arith.constant 1 : i32
      %67 = vector.broadcast %c1_i32_39 : i32 to vector<8x128xi32>
      %68 = arith.cmpi eq, %64, %67 : vector<8x128xi32>
      %c2_i32 = arith.constant 2 : i32
      %69 = vector.broadcast %c2_i32 : i32 to vector<8x128xi32>
      %70 = arith.cmpi eq, %64, %69 : vector<8x128xi32>
      %cst_40 = arith.constant 0.000000e+00 : f32
      %71 = vector.shape_cast %63 : vector<1x1xf32> to vector<1x1xf32>
      %72 = vector.broadcast %71 : vector<1x1xf32> to vector<8x128xf32>
      %73 = vector.broadcast %cst_40 : f32 to vector<8x128xf32>
      %74 = arith.select %70, %72, %73 : vector<8x128xi1>, vector<8x128xf32>
      %75 = vector.shape_cast %62 : vector<1x1xf32> to vector<1x1xf32>
      %76 = vector.broadcast %75 : vector<1x1xf32> to vector<8x128xf32>
      %77 = arith.select %68, %76, %74 : vector<8x128xi1>, vector<8x128xf32>
      %78 = vector.shape_cast %61 : vector<1x1xf32> to vector<1x1xf32>
      %79 = vector.broadcast %78 : vector<1x1xf32> to vector<8x128xf32>
      %80 = arith.select %66, %79, %77 : vector<8x128xi1>, vector<8x128xf32>
      %c0_41 = arith.constant 0 : index
      %c0_42 = arith.constant 0 : index
      %81 = vector.load %arg4[%c0_41, %c0_42] : memref<8x128xf32, #tpu.memory_space<vmem>>, vector<8x128xf32>
      tpu.vector_store %arg4[%c0_41, %c0_42], %80 {strides = array<i32>} : memref<8x128xf32, #tpu.memory_space<vmem>>, vector<8x128xf32>,
    } else {
    }
    return
  }
  func.func @transform_0(%arg0: i32, %arg1: i32) -> (i32, i32) {
    %c1_i32 = arith.constant 1 : i32
    %0 = arith.muli %arg0, %c1_i32 : i32
    %1 = arith.addi %0, %arg1 : i32
    %c0_i32 = arith.constant 0 : i32
    %2 = arith.minsi %1, %c0_i32 : i32
    %c0_i32_0 = arith.constant 0 : i32
    %c0_i32_1 = arith.constant 0 : i32
    return %2, %c0_i32_0 : i32, i32
  }
  func.func @transform_1(%arg0: i32, %arg1: i32) -> (i32, i32) {
    %c1_i32 = arith.constant 1 : i32
    %0 = arith.muli %arg0, %c1_i32 : i32
    %1 = arith.addi %0, %arg1 : i32
    %c0_i32 = arith.constant 0 : i32
    %2 = arith.minsi %1, %c0_i32 : i32
    %c0_i32_0 = arith.constant 0 : i32
    %c0_i32_1 = arith.constant 0 : i32
    return %2, %c0_i32_0 : i32, i32
  }
  func.func @transform_2(%arg0: i32, %arg1: i32) -> (i32, i32) {
    %c0_i32 = arith.constant 0 : i32
    %c0_i32_0 = arith.constant 0 : i32
    return %arg0, %c0_i32 : i32, i32
  }
  func.func @transform_3(%arg0: i32, %arg1: i32) -> (i32, i32) {
    %c1_i32 = arith.constant 1 : i32
    %0 = arith.muli %arg0, %c1_i32 : i32
    %1 = arith.addi %0, %arg1 : i32
    %c0_i32 = arith.constant 0 : i32
    %c0_i32_0 = arith.constant 0 : i32
    return %1, %c0_i32 : i32, i32
  }
  func.func @transform_4(%arg0: i32, %arg1: i32) -> (i32, i32) {
    %c1_i32 = arith.constant 1 : i32
    %0 = arith.muli %arg0, %c1_i32 : i32
    %1 = arith.addi %0, %arg1 : i32
    %c0_i32 = arith.constant 0 : i32
    %c0_i32_0 = arith.constant 0 : i32
    return %1, %c0_i32 : i32, i32
  }
}

module attributes {stable_mosaic.version = 11 : i64} {
  func.func @_node_kernel(%arg0: i32, %arg1: i32, %arg2: memref<8x32xf32, #tpu.memory_space<vmem>>, %arg3: memref<8x32xf32, #tpu.memory_space<vmem>>, %arg4: memref<8x128xf32, #tpu.memory_space<vmem>>, %arg5: memref<1x32xf32, #tpu.memory_space<vmem>>) attributes {dimension_semantics = [#tpu.dimension_semantics<parallel>, #tpu.dimension_semantics<arbitrary>], iteration_bounds = array<i64: 2, 1>, scalar_prefetch = 0 : i64, scratch_operands = 1 : i64, tpu.core_type = #tpu.core_type<tc>, window_params = [{transform_indices = @transform_0, window_bounds = array<i64: 8, 32>}, {transform_indices = @transform_1, window_bounds = array<i64: 8, 32>}, {transform_indices = @transform_2, window_bounds = array<i64: 8, 128>}]} {
    %c0_i32 = arith.constant 0 : i32
    %0 = arith.cmpi eq, %arg1, %c0_i32 : i32
    %1 = arith.extui %0 : i1 to i32
    %c0_i32_0 = arith.constant 0 : i32
    %2 = arith.cmpi ne, %1, %c0_i32_0 : i32
    scf.if %2 {
      %cst_17 = arith.constant 0.000000e+00 : f32
      %43 = vector.broadcast %cst_17 : f32 to vector<1x32xf32>
      %c0_18 = arith.constant 0 : index
      %c0_19 = arith.constant 0 : index
      %44 = vector.load %arg5[%c0_18, %c0_19] : memref<1x32xf32, #tpu.memory_space<vmem>>, vector<1x32xf32>
      tpu.vector_store %arg5[%c0_18, %c0_19], %43 {strides = array<i32>} : memref<1x32xf32, #tpu.memory_space<vmem>>, vector<1x32xf32>,
    } else {
    }
    %c1_i32 = arith.constant 1 : i32
    %3 = arith.muli %arg0, %c1_i32 : i32
    %4 = arith.addi %3, %arg1 : i32
    %c8_i32 = arith.constant 8 : i32
    %5 = arith.muli %4, %c8_i32 : i32
    %6 = tpu.iota {dimensions = array<i32: 0>} : vector<8x32xi32>
    %7 = vector.broadcast %5 : i32 to vector<8x32xi32>
    %8 = arith.addi %6, %7 : vector<8x32xi32>
    %c8_i32_1 = arith.constant 8 : i32
    %9 = vector.broadcast %c8_i32_1 : i32 to vector<8x32xi32>
    %10 = arith.cmpi slt, %8, %9 : vector<8x32xi32>
    %c0 = arith.constant 0 : index
    %c0_2 = arith.constant 0 : index
    %11 = vector.load %arg2[%c0, %c0_2] : memref<8x32xf32, #tpu.memory_space<vmem>>, vector<8x32xf32>
    %cst = arith.constant 0.000000e+00 : f32
    %12 = vector.broadcast %cst : f32 to vector<8x32xf32>
    %13 = arith.select %10, %11, %12 : vector<8x32xi1>, vector<8x32xf32>
    %14 = arith.mulf %13, %13 : vector<8x32xf32>
    %cst_3 = arith.constant dense<0.000000e+00> : vector<8xf32>
    %15 = vector.multi_reduction <add>, %14, %cst_3 [1] : vector<8x32xf32> to vector<8xf32>
    %16 = vector.shape_cast %15 : vector<8xf32> to vector<8x1xf32>
    %cst_4 = arith.constant 1.000000e-24 : f32
    %17 = vector.broadcast %cst_4 : f32 to vector<8x1xf32>
    %18 = arith.maximumf %16, %17 : vector<8x1xf32>
    %19 = math.rsqrt %18 : vector<8x1xf32>
    %20 = vector.broadcast %19 : vector<8x1xf32> to vector<8x32xf32>
    %21 = arith.mulf %13, %20 : vector<8x32xf32>
    %c0_5 = arith.constant 0 : index
    %c0_6 = arith.constant 0 : index
    %22 = vector.load %arg3[%c0_5, %c0_6] : memref<8x32xf32, #tpu.memory_space<vmem>>, vector<8x32xf32>
    %cst_7 = arith.constant 0.000000e+00 : f32
    %23 = vector.broadcast %cst_7 : f32 to vector<8x32xf32>
    %24 = arith.select %10, %22, %23 : vector<8x32xi1>, vector<8x32xf32>
    %25 = arith.mulf %24, %24 : vector<8x32xf32>
    %cst_8 = arith.constant dense<0.000000e+00> : vector<8xf32>
    %26 = vector.multi_reduction <add>, %25, %cst_8 [1] : vector<8x32xf32> to vector<8xf32>
    %27 = vector.shape_cast %26 : vector<8xf32> to vector<8x1xf32>
    %cst_9 = arith.constant 1.000000e-24 : f32
    %28 = vector.broadcast %cst_9 : f32 to vector<8x1xf32>
    %29 = arith.maximumf %27, %28 : vector<8x1xf32>
    %30 = math.rsqrt %29 : vector<8x1xf32>
    %31 = vector.broadcast %30 : vector<8x1xf32> to vector<8x32xf32>
    %32 = arith.mulf %24, %31 : vector<8x32xf32>
    %33 = arith.subf %21, %32 : vector<8x32xf32>
    %c0_10 = arith.constant 0 : index
    %c0_11 = arith.constant 0 : index
    %34 = vector.load %arg5[%c0_10, %c0_11] : memref<1x32xf32, #tpu.memory_space<vmem>>, vector<1x32xf32>
    %35 = arith.mulf %33, %33 : vector<8x32xf32>
    %cst_12 = arith.constant dense<0.000000e+00> : vector<32xf32>
    %36 = vector.multi_reduction <add>, %35, %cst_12 [0] : vector<8x32xf32> to vector<32xf32>
    %37 = vector.shape_cast %36 : vector<32xf32> to vector<1x32xf32>
    %38 = arith.addf %34, %37 : vector<1x32xf32>
    %c0_13 = arith.constant 0 : index
    %c0_14 = arith.constant 0 : index
    %39 = vector.load %arg5[%c0_13, %c0_14] : memref<1x32xf32, #tpu.memory_space<vmem>>, vector<1x32xf32>
    tpu.vector_store %arg5[%c0_13, %c0_14], %38 {strides = array<i32>} : memref<1x32xf32, #tpu.memory_space<vmem>>, vector<1x32xf32>,
    %c0_i32_15 = arith.constant 0 : i32
    %40 = arith.cmpi eq, %arg1, %c0_i32_15 : i32
    %41 = arith.extui %40 : i1 to i32
    %c0_i32_16 = arith.constant 0 : i32
    %42 = arith.cmpi ne, %41, %c0_i32_16 : i32
    scf.if %42 {
      %c0_17 = arith.constant 0 : index
      %c0_18 = arith.constant 0 : index
      %43 = vector.load %arg5[%c0_17, %c0_18] : memref<1x32xf32, #tpu.memory_space<vmem>>, vector<1x32xf32>
      %cst_19 = arith.constant dense<0.000000e+00> : vector<1xf32>
      %44 = vector.multi_reduction <add>, %43, %cst_19 [1] : vector<1x32xf32> to vector<1xf32>
      %45 = vector.shape_cast %44 : vector<1xf32> to vector<1x1xf32>
      %cst_20 = arith.constant 0.000000e+00 : f32
      %46 = vector.broadcast %cst_20 : f32 to vector<8x128xf32>
      %47 = vector.broadcast %45 : vector<1x1xf32> to vector<8x128xf32>
      %48 = arith.addf %46, %47 : vector<8x128xf32>
      %c0_21 = arith.constant 0 : index
      %c0_22 = arith.constant 0 : index
      %49 = vector.load %arg4[%c0_21, %c0_22] : memref<8x128xf32, #tpu.memory_space<vmem>>, vector<8x128xf32>
      tpu.vector_store %arg4[%c0_21, %c0_22], %48 {strides = array<i32>} : memref<8x128xf32, #tpu.memory_space<vmem>>, vector<8x128xf32>,
    } else {
    }
    return
  }
  func.func @transform_0(%arg0: i32, %arg1: i32) -> (i32, i32) {
    %c1_i32 = arith.constant 1 : i32
    %0 = arith.muli %arg0, %c1_i32 : i32
    %1 = arith.addi %0, %arg1 : i32
    %c0_i32 = arith.constant 0 : i32
    %2 = arith.minsi %1, %c0_i32 : i32
    %c0_i32_0 = arith.constant 0 : i32
    %c0_i32_1 = arith.constant 0 : i32
    return %2, %c0_i32_0 : i32, i32
  }
  func.func @transform_1(%arg0: i32, %arg1: i32) -> (i32, i32) {
    %c1_i32 = arith.constant 1 : i32
    %0 = arith.muli %arg0, %c1_i32 : i32
    %1 = arith.addi %0, %arg1 : i32
    %c0_i32 = arith.constant 0 : i32
    %2 = arith.minsi %1, %c0_i32 : i32
    %c0_i32_0 = arith.constant 0 : i32
    %c0_i32_1 = arith.constant 0 : i32
    return %2, %c0_i32_0 : i32, i32
  }
  func.func @transform_2(%arg0: i32, %arg1: i32) -> (i32, i32) {
    %c0_i32 = arith.constant 0 : i32
    %c0_i32_0 = arith.constant 0 : i32
    return %arg0, %c0_i32 : i32, i32
  }
}

module attributes {stable_mosaic.version = 11 : i64} {
  func.func @_finalize_kernel(%arg0: i32, %arg1: memref<16x128xf32, #tpu.memory_space<smem>>, %arg2: memref<16x128xf32, #tpu.memory_space<smem>>, %arg3: memref<2x8xf32, #tpu.memory_space<vmem>>, %arg4: memref<2x8xf32, #tpu.memory_space<vmem>>, %arg5: memref<8x128xf32, #tpu.memory_space<vmem>>, %arg6: memref<1xf32, #tpu.memory_space<smem>>) attributes {dimension_semantics = [#tpu.dimension_semantics<arbitrary>], iteration_bounds = array<i64: 1>, scalar_prefetch = 0 : i64, scratch_operands = 1 : i64, tpu.core_type = #tpu.core_type<tc>, window_params = [{transform_indices = @transform_0, window_bounds = array<i64: 16, 128>}, {transform_indices = @transform_1, window_bounds = array<i64: 16, 128>}, {transform_indices = @transform_2, window_bounds = array<i64: 2, 8>}, {transform_indices = @transform_3, window_bounds = array<i64: 2, 8>}, {pipeline_mode = #tpu.pipeline_mode<synchronous>, transform_indices = @transform_4, window_bounds = array<i64: 8, 128>}]} {
    %c0_i32 = arith.constant 0 : i32
    %0 = arith.cmpi eq, %arg0, %c0_i32 : i32
    %1 = arith.extui %0 : i1 to i32
    %c0_i32_0 = arith.constant 0 : i32
    %2 = arith.cmpi ne, %1, %c0_i32_0 : i32
    scf.if %2 {
      %cst_17 = arith.constant 0.000000e+00 : f32
      %c0_18 = arith.constant 0 : index
      %39 = memref.load %arg6[%c0_18] : memref<1xf32, #tpu.memory_space<smem>>
      memref.store %cst_17, %arg6[%c0_18] : memref<1xf32, #tpu.memory_space<smem>>
    } else {
    }
    %c0 = arith.constant 0 : index
    %c1 = arith.constant 1 : index
    %3 = memref.load %arg2[%c0, %c1] : memref<16x128xf32, #tpu.memory_space<smem>>
    %c8 = arith.constant 8 : index
    %c1_1 = arith.constant 1 : index
    %4 = memref.load %arg2[%c8, %c1_1] : memref<16x128xf32, #tpu.memory_space<smem>>
    %5 = arith.addf %3, %4 : f32
    %c0_2 = arith.constant 0 : index
    %c2 = arith.constant 2 : index
    %6 = memref.load %arg2[%c0_2, %c2] : memref<16x128xf32, #tpu.memory_space<smem>>
    %c8_3 = arith.constant 8 : index
    %c2_4 = arith.constant 2 : index
    %7 = memref.load %arg2[%c8_3, %c2_4] : memref<16x128xf32, #tpu.memory_space<smem>>
    %8 = arith.addf %6, %7 : f32
    %cst = arith.constant 1.000000e-24 : f32
    %9 = arith.maximumf %5, %cst : f32
    %10 = math.rsqrt %9 : f32
    %cst_5 = arith.constant 1.000000e-24 : f32
    %11 = arith.maximumf %8, %cst_5 : f32
    %12 = math.rsqrt %11 : f32
    %13 = tpu.iota {dimensions = array<i32: 0>} : vector<2x8xi32>
    %c2_i32 = arith.constant 2 : i32
    %14 = arith.muli %arg0, %c2_i32 : i32
    %15 = vector.broadcast %14 : i32 to vector<2x8xi32>
    %16 = arith.addi %13, %15 : vector<2x8xi32>
    %c0_6 = arith.constant 0 : index
    %c0_7 = arith.constant 0 : index
    %17 = vector.load %arg3[%c0_6, %c0_7] : memref<2x8xf32, #tpu.memory_space<vmem>>, vector<2x8xf32>
    %18 = vector.broadcast %10 : f32 to vector<2x8xf32>
    %19 = arith.mulf %17, %18 : vector<2x8xf32>
    %c0_8 = arith.constant 0 : index
    %c0_9 = arith.constant 0 : index
    %20 = vector.load %arg4[%c0_8, %c0_9] : memref<2x8xf32, #tpu.memory_space<vmem>>, vector<2x8xf32>
    %21 = vector.broadcast %12 : f32 to vector<2x8xf32>
    %22 = arith.mulf %20, %21 : vector<2x8xf32>
    %23 = arith.subf %19, %22 : vector<2x8xf32>
    %24 = math.absf %23 : vector<2x8xf32>
    %c2_i32_10 = arith.constant 2 : i32
    %25 = vector.broadcast %c2_i32_10 : i32 to vector<2x8xi32>
    %26 = arith.cmpi slt, %16, %25 : vector<2x8xi32>
    %cst_11 = arith.constant 0.000000e+00 : f32
    %27 = vector.broadcast %cst_11 : f32 to vector<2x8xf32>
    %28 = arith.select %26, %24, %27 : vector<2x8xi1>, vector<2x8xf32>
    %c0_12 = arith.constant 0 : index
    %29 = memref.load %arg6[%c0_12] : memref<1xf32, #tpu.memory_space<smem>>
    %30 = vector.shape_cast %28 : vector<2x8xf32> to vector<1x2x8xf32>
    %cst_13 = arith.constant dense<0.000000e+00> : vector<1xf32>
    %31 = vector.multi_reduction <add>, %30, %cst_13 [1, 2] : vector<1x2x8xf32> to vector<1xf32>
    %32 = vector.shape_cast %31 : vector<1xf32> to vector<1x1x1xf32>
    %33 = vector.extract %32[0, 0, 0] : f32 from vector<1x1x1xf32>
    %34 = arith.addf %29, %33 : f32
    %c0_14 = arith.constant 0 : index
    %35 = memref.load %arg6[%c0_14] : memref<1xf32, #tpu.memory_space<smem>>
    memref.store %34, %arg6[%c0_14] : memref<1xf32, #tpu.memory_space<smem>>
    %c0_i32_15 = arith.constant 0 : i32
    %36 = arith.cmpi eq, %arg0, %c0_i32_15 : i32
    %37 = arith.extui %36 : i1 to i32
    %c0_i32_16 = arith.constant 0 : i32
    %38 = arith.cmpi ne, %37, %c0_i32_16 : i32
    scf.if %38 {
      %c0_17 = arith.constant 0 : index
      %c0_18 = arith.constant 0 : index
      %39 = memref.load %arg1[%c0_17, %c0_18] : memref<16x128xf32, #tpu.memory_space<smem>>
      %c8_19 = arith.constant 8 : index
      %c0_20 = arith.constant 0 : index
      %40 = memref.load %arg1[%c8_19, %c0_20] : memref<16x128xf32, #tpu.memory_space<smem>>
      %41 = arith.addf %39, %40 : f32
      %c0_21 = arith.constant 0 : index
      %c0_22 = arith.constant 0 : index
      %42 = memref.load %arg2[%c0_21, %c0_22] : memref<16x128xf32, #tpu.memory_space<smem>>
      %c8_23 = arith.constant 8 : index
      %c0_24 = arith.constant 0 : index
      %43 = memref.load %arg2[%c8_23, %c0_24] : memref<16x128xf32, #tpu.memory_space<smem>>
      %44 = arith.addf %42, %43 : f32
      %cst_25 = arith.constant 2.560000e+02 : f32
      %45 = arith.divf %41, %cst_25 : f32
      %cst_26 = arith.constant 1.000000e+01 : f32
      %46 = arith.minimumf %45, %cst_26 : f32
      %cst_27 = arith.constant 2.560000e+02 : f32
      %47 = arith.divf %44, %cst_27 : f32
      %cst_28 = arith.constant 1.000000e+01 : f32
      %48 = arith.minimumf %47, %cst_28 : f32
      %c0_29 = arith.constant 0 : index
      %49 = memref.load %arg6[%c0_29] : memref<1xf32, #tpu.memory_space<smem>>
      %cst_30 = arith.constant 8.000000e+00 : f32
      %50 = arith.divf %49, %cst_30 : f32
      %cst_31 = arith.constant 1.000000e+01 : f32
      %51 = arith.minimumf %50, %cst_31 : f32
      %cst_32 = arith.constant 1.000000e+00 : f32
      %52 = arith.mulf %cst_32, %46 : f32
      %cst_33 = arith.constant 5.000000e-01 : f32
      %53 = arith.mulf %cst_33, %48 : f32
      %54 = arith.addf %52, %53 : f32
      %cst_34 = arith.constant 1.000000e-01 : f32
      %55 = arith.mulf %cst_34, %51 : f32
      %56 = arith.addf %54, %55 : f32
      %57 = tpu.iota {dimensions = array<i32: 1>} : vector<8x128xi32>
      %c0_i32_35 = arith.constant 0 : i32
      %58 = vector.broadcast %c0_i32_35 : i32 to vector<8x128xi32>
      %59 = arith.cmpi eq, %57, %58 : vector<8x128xi32>
      %c1_i32 = arith.constant 1 : i32
      %60 = vector.broadcast %c1_i32 : i32 to vector<8x128xi32>
      %61 = arith.cmpi eq, %57, %60 : vector<8x128xi32>
      %c2_i32_36 = arith.constant 2 : i32
      %62 = vector.broadcast %c2_i32_36 : i32 to vector<8x128xi32>
      %63 = arith.cmpi eq, %57, %62 : vector<8x128xi32>
      %c3_i32 = arith.constant 3 : i32
      %64 = vector.broadcast %c3_i32 : i32 to vector<8x128xi32>
      %65 = arith.cmpi eq, %57, %64 : vector<8x128xi32>
      %cst_37 = arith.constant 0.000000e+00 : f32
      %66 = vector.broadcast %56 : f32 to vector<8x128xf32>
      %67 = vector.broadcast %cst_37 : f32 to vector<8x128xf32>
      %68 = arith.select %65, %66, %67 : vector<8x128xi1>, vector<8x128xf32>
      %69 = vector.broadcast %51 : f32 to vector<8x128xf32>
      %70 = arith.select %63, %69, %68 : vector<8x128xi1>, vector<8x128xf32>
      %71 = vector.broadcast %48 : f32 to vector<8x128xf32>
      %72 = arith.select %61, %71, %70 : vector<8x128xi1>, vector<8x128xf32>
      %73 = vector.broadcast %46 : f32 to vector<8x128xf32>
      %74 = arith.select %59, %73, %72 : vector<8x128xi1>, vector<8x128xf32>
      %c0_38 = arith.constant 0 : index
      %c0_39 = arith.constant 0 : index
      %75 = vector.load %arg5[%c0_38, %c0_39] : memref<8x128xf32, #tpu.memory_space<vmem>>, vector<8x128xf32>
      tpu.vector_store %arg5[%c0_38, %c0_39], %74 {strides = array<i32>} : memref<8x128xf32, #tpu.memory_space<vmem>>, vector<8x128xf32>,
    } else {
    }
    return
  }
  func.func @transform_0(%arg0: i32) -> (i32, i32) {
    %c0_i32 = arith.constant 0 : i32
    %c0_i32_0 = arith.constant 0 : i32
    %c0_i32_1 = arith.constant 0 : i32
    return %c0_i32, %c0_i32_0 : i32, i32
  }
  func.func @transform_1(%arg0: i32) -> (i32, i32) {
    %c0_i32 = arith.constant 0 : i32
    %c0_i32_0 = arith.constant 0 : i32
    %c0_i32_1 = arith.constant 0 : i32
    return %c0_i32, %c0_i32_0 : i32, i32
  }
  func.func @transform_2(%arg0: i32) -> (i32, i32) {
    %c0_i32 = arith.constant 0 : i32
    %c0_i32_0 = arith.constant 0 : i32
    return %arg0, %c0_i32 : i32, i32
  }
  func.func @transform_3(%arg0: i32) -> (i32, i32) {
    %c0_i32 = arith.constant 0 : i32
    %c0_i32_0 = arith.constant 0 : i32
    return %arg0, %c0_i32 : i32, i32
  }
  func.func @transform_4(%arg0: i32) -> (i32, i32) {
    %c0_i32 = arith.constant 0 : i32
    %c0_i32_0 = arith.constant 0 : i32
    %c0_i32_1 = arith.constant 0 : i32
    return %c0_i32, %c0_i32_0 : i32, i32
  }
}

</mosaic_0001>

<bundles_post_ra>
// kernel: _process_mapping_loss_impl.4
= control target key start
LH: loop header
LB: loop body
LE: loop exit
PB: predicated region body
PF: predicated region fallthrough
CT: control target
= control target key end

     0   :  { %10 = vsyncpa [#allocation6], 0  ;;  %s881_s0 = inlined_call_operand.vmem [shape: f32[8,32], index: 0, kind: input, shape index: {}]   ;;  %s882_s1 = inlined_call_operand.hbm [shape: f32[8,32], index: 1, kind: input, shape index: {}]   ;;  %s883_s2 = inlined_call_operand.vmem [shape: f32[16,128], index: 2, kind: output, shape index: {0}]   ;;  %s884_s3 = inlined_call_operand.vmem [shape: f32[16,1], index: 3, kind: output, shape index: {1}]   ;;  %s885_s4 = inlined_call_operand.vmem [shape: f32[16,1], index: 4, kind: output, shape index: {2}]  }
   0x1   :  { %12 = vsyncpa [#allocation6 + $0x1], 0  ;;  %s763_s15 = smov 0   ;;  %s765_s16 = smov 0  }
   0x2   :  { %s767_s17 = smov 0   ;;  %s769_s18 = smov 0  }
   0x3   :  { %s771_s19 = smov 0  }
   0x4 LB: > { %s573_s20 = sadd.s32 4294967295, %s733_s19   ;;  %s30_s21 = sadd.s32 1, %s729_s18  ;;  %s733_s19 = sphi %s771_s19, %s18_s19   ;;  %s729_s18 = sphi %s769_s18, %s896_s18   ;;  %s725_s17 = sphi %s767_s17, %s895_s17   ;;  %s721_s16 = sphi %s765_s16, %s871_s16   ;;  %s717_s15 = sphi %s763_s15, %s894_s15  }
   0x5   : > { %p32_p0 = scmp.ge.s32.totalorder %s30_s21, 2  ;;  %p714_p1 = scmp.ne.s32.totalorder %s721_s16, 0 }
   0x6   : > { %p83_p2 = scmp.eq.s32.totalorder %s733_s19, 0  ;;  %p88_p3 = scmp.ne.s32.totalorder %s721_s16, %s717_s15 }
   0x7   : > { %s898_s21 = smov (%p32_p0, %s30_s21), 0  ;;  %p89_p4 = scmp.eq.s32.totalorder %s573_s20, 0 }
   0x8   : > { %p84_p5 = por %p714_p1, %p83_p2  ;;  %p599_p7 = scmp.lt.s32.totalorder %s733_s19, 2 }
   0x9   : > { %p793_p6 = por %p89_p4, %p88_p3  ;;  %s735_s23 = smov [#allocation5]  }
   0xa   : > { %s221_s24 = sshll.u32 %s735_s23, 4  ;;  %p798_p8 = pnand %p599_p7, %p84_p5  ;;  %s222_s24 = int_to_ptr.vmem [resolvable:$true] %s221_s24 }
   0xb   : > { %s888_s22 = scalar_select %p793_p6, 1, 0 }
   0xc   : > { %s889_s25 = scalar_select %p798_p8, 1, 0 }
   0xd   : > { %s656_s28 = scalar_lea.hbm %s882_s1, 128  ;;  %p658_p12 = pneg %p798_p8 }
   0xe   : > { %p657_p11 = scmp.ne.s32.totalorder %s882_s1, %s656_s28  ;;  %p663_p1 = scmp.lt.u32.totalorder %s656_s28, %s656_s28 }
   0xf   : > { %p665_p2 = scmp.lt.u32.totalorder %s656_s28, %s882_s1 }
  0x10   : > { %p659_p13 = pnand %p658_p12, %p657_p11 }
  0x11   : > { %p666_p3 = por %p665_p2, %p663_p1 }
  0x12   : > { %p660_p0 = pneg %p659_p13 }
  0x14   : > { %p667_p4 = pnand %p666_p3, %p660_p0 }
  0x16   : > { %670 = shalt.err (!%p667_p4)
}
  0x17   : > { %s671_s7 = scalar_lea.vmem %s222_s24, 128  ;;  %s678_s8 = scalar_lea.vmem %s222_s24, 256 }
  0x18   : > { %p672_p5 = scmp.ne.s32.totalorder %s222_s24, %s671_s7  ;;  %p679_p10 = scmp.lt.s32.totalorder %s222_s24, %s222_s24 }
  0x19   : > { %p680_p6 = scmp.lt.s32.totalorder %s678_s8, %s671_s7 }
  0x1a   : > { %p674_p7 = pnand %p672_p5, %p658_p12 }
  0x1b   : > { %p681_p8 = por %p680_p6, %p679_p10 }
  0x1c   : > { %p675_p9 = pneg %p674_p7 }
  0x1e   : > { %p682_p11 = pnand %p681_p8, %p675_p9 }
  0x20   : > { %685 = shalt.err (!%p682_p11)
}
  0x21   : > { %p890_p13 = scmp.ne.s32.totalorder %s889_s25, 0  ;;  %p891_p0 = scmp.lt.s32.totalorder %s733_s19, 3 }
  0x22   : > { %p892_p1 = scmp.ge.s32.totalorder %s733_s19, 1 }
  0x23   : > { %598 = dma.hbm_to_vmem [thread:$0]  (!%p890_p13), %s882_s1, 128, %s222_s24, [#allocation6]  }
  0x24   : > { %p227_p2 = pnand %p892_p1, %p891_p0 }
  0x25   : > { %s232_s11 = sand.u32 (!%p227_p2), 1, %s721_s16   ;;  %p893_p6 = scmp.ne.s32.totalorder (!%p227_p2), %s888_s22, 0 }
  0x26   : > { %230 = sbr.rel (%p227_p2) target bundleno = 397 (0x18d), region = 28  ;;  %s580_s12 = sshll.u32 (!%p227_p2), %s232_s11, 3 }
  0x27   : > { %s233_s13 = scalar_lea.sflag (!%p227_p2), [#allocation6], %s232_s11  ;;  %s236_s14 = scalar_lea.vmem (!%p227_p2), [#allocation5], %s580_s12 }
  0x2d   : > { %711 = dma.done.wait (%p893_p6), %s233_s13, 128  }
  0x2e   : > { %713 = vsyncadd (%p893_p6), %s233_s13, 4294967168  ;;  %p278_p8 = scmp.lt.s32.totalorder %s725_s17, 0  ;;  %s588_s15 = sshll.u32 %s725_s17, 3  ;;  %v317_v0 = vlaneseq  ;;  %vm312_vm0 = vcmask 0   ;;  %v736_v2 = vmov 0.0   ;;  %v332_v5 = vld [vmem:[%s236_s14] sm:$0xff] }
  0x2f   : > { %v319_v1 = vstv %s588_s15  ;;  %313 = vst.msk [vmem:[#allocation3] sm:$0x1] %vm312_vm0, %v736_v2  ;;  %314 = vst.msk [vmem:[#allocation4] sm:$0x1] %vm312_vm0, %v736_v2  ;;  %vm325_vm2 = vcmask 261120   ;;  %vm310_vm3 = vcmask 253952  }
  0x30   : > { %s279_s20 = scalar_select %p278_p8, %s725_s17, 0  ;;  %v835_v3 = vshrl.u32 %v317_v0, 7  ;;  %311 = vst.msk [vmem:[#allocation2] sm:$0x1] %vm310_vm3, %v736_v2  ;;  %v737_v13 = vmov 0   ;;  %vm356_vm4 = vcmask 7168  }
  0x31   : > { %651 = vset.pattern.permute.xlu0 %v737_v13  ;;  %650 = vset.pattern.permute.xlu1 %v737_v13  ;;  %p290_p9 = scmp.lt.s32.totalorder %s725_s17, 1  ;;  %v390_v57 = vand.u32 127, %v317_v0 }
  0x32   : > { %s900_s20 = smov (!%p278_p8, %s279_s20), 0  ;;  %v320_v4 = vadd.s32 %v319_v1, %v835_v3  ;;  %v416_v59 = vsub.s32 0, %v835_v3 }
  0x33   : > { %s584_s22 = sshll.u32 %s900_s20, 3  ;;  %s902_s17 = smov (!%p290_p9, %s725_s17), 1  ;;  %vm393_vm5 = vcmp.eq.s32.totalorder %v390_v57, 2  ;;  %vm392_vm6 = vcmp.eq.s32.totalorder %v390_v57, 1  ;;  %vm391_vm7 = vcmp.eq.s32.totalorder %v390_v57, 0 }
  0x34   : > { %vm321_vm1 = vcmp.lt.s32.totalorder %v320_v4, 8  ;;  %s283_s25 = scalar_lea.vmem %s881_s0, %s584_s22  ;;  %s846_s26 = sshll.u32 %s902_s17, 3 }
  0x35   : > { %v322_v6 = vld [vmem:[%s283_s25] sm:$0xff]  ;;  %v333_v7 = vsel %vm321_vm1, %v332_v5, 0.0  ;;  %s298_s29 = scalar_lea.vmem %s884_s3, %s846_s26  ;;  %s304_s6 = scalar_lea.vmem %s885_s4, %s846_s26 }
  0x36   : > { %v323_v8 = vsel %vm321_vm1, %v322_v6, 0.0  ;;  %v334_v10 = vmul.f32 %v333_v7, %v333_v7  ;;  %v354_v39 = vld [vmem:[#allocation3] sm:$0x1]  ;;  %v367_v46 = vld [vmem:[#allocation4] sm:$0x1]  ;;  %s293_s8 = scalar_lea.vmem %s883_s2, %s846_s26 }
  0x37   : > { %v324_v9 = vmul.f32 %v323_v8, %v323_v8  ;;  %v342_v49 = vld [vmem:[#allocation2] sm:$0x1] }
  0x38   : > { %v335_v12 = vsel %vm325_vm2, %v334_v10, 0.0 }
  0x39   : > { %v326_v11 = vsel %vm325_vm2, %v324_v9, 0.0 }
  0x3a   : > { %327 = vadd.xlane.f32.xlu0 %v326_v11 }
  0x3e   : > { %336 = vadd.xlane.f32.xlu0 %v335_v12 }
  0xc7   : > { %v328_v14 = vpop.xlane.xlu0 %327 }
  0xc8   : > { %v329_v15 = vmax.f32 %v328_v14, 1e-24 }
  0xca   : > { %652 = vrsqrt.f32 %v329_v15 }
  0xcb   : > { %v337_v16 = vpop.xlane.xlu0 %336 }
  0xcc   : > { %v338_v17 = vmax.f32 %v337_v16, 1e-24 }
  0xce   : > { %654 = vrsqrt.f32 %v338_v17 }
  0xd4   : > { %v653_v18 = vpop.eup %652 }
  0xd5   : > { %v331_v19 = vmul.f32 %v653_v18, %v323_v8 }
  0xd7   : > { %v355_v20 = vmul.f32 %v331_v19, %v331_v19  ;;  %378 = vst.msk [vmem:[%s298_s29] sm:$0xff] %vm356_vm4, %v331_v19 }
  0xd8   : > { %v655_v21 = vpop.eup %654 }
  0xd9   : > { %v357_v22 = vsel %vm356_vm4, %v355_v20, 0.0  ;;  %v340_v23 = vmul.f32 %v655_v21, %v333_v7 }
  0xda   : > { %v358_v24 = vrot.slane %v357_v22, 4 }
  0xdb   : > { %v341_v25 = vsub.f32 %v331_v19, %v340_v23  ;;  %v368_v26 = vmul.f32 %v340_v23, %v340_v23  ;;  %379 = vst.msk [vmem:[%s304_s6] sm:$0xff] %vm356_vm4, %v340_v23 }
  0xdc   : > { %v359_v27 = vadd.f32 %v358_v24, %v357_v22 }
  0xdd   : > { %v343_v28 = vmul.f32 %v341_v25, %v341_v25  ;;  %v369_v29 = vsel %vm356_vm4, %v368_v26, 0.0 }
  0xde   : > { %v360_v30 = vrot.slane %v359_v27, 2  ;;  %v370_v31 = vrot.slane %v369_v29, 4 }
  0xdf   : > { %v344_v32 = vsel %vm325_vm2, %v343_v28, 0.0 }
  0xe0   : > { %v361_v33 = vadd.f32 %v360_v30, %v359_v27  ;;  %v345_v34 = vrot.slane %v344_v32, 4  ;;  %v371_v35 = vadd.f32 %v370_v31, %v369_v29 }
  0xe2   : > { %v362_v36 = vrot.slane %v361_v33, 1  ;;  %v346_v37 = vadd.f32 %v345_v34, %v344_v32  ;;  %v372_v38 = vrot.slane %v371_v35, 2 }
  0xe4   : > { %v363_v40 = vadd.f32 %v362_v36, %v361_v33  ;;  %v373_v41 = vadd.f32 %v372_v38, %v371_v35  ;;  %v347_v42 = vrot.slane %v346_v37, 2 }
  0xe6   : > { %v364_v43 = vadd.f32 %v363_v40, %v354_v39  ;;  %v374_v44 = vrot.slane %v373_v41, 1  ;;  %v348_v45 = vadd.f32 %v347_v42, %v346_v37 }
  0xe8   : > { %366 = vst.msk [vmem:[#allocation3] sm:$0x1] %vm312_vm0, %v364_v43  ;;  %v375_v47 = vadd.f32 %v374_v44, %v373_v41  ;;  %v349_v48 = vrot.slane %v348_v45, 1 }
  0xea   : > { %v376_v50 = vadd.f32 %v375_v47, %v367_v46  ;;  %v350_v51 = vadd.f32 %v349_v48, %v348_v45 }
  0xec   : > { %377 = vst.msk [vmem:[#allocation4] sm:$0x1] %vm312_vm0, %v376_v50  ;;  %v351_v52 = vadd.f32 %v350_v51, %v342_v49 }
  0xee   : > { %353 = vst.msk [vmem:[#allocation2] sm:$0x1] %vm310_vm3, %v351_v52 }
  0xef   : > { %v590_v53 = vld [vmem:[#allocation3] ss:$0 sm:$0xff] }
  0xf0   : > { %410 = vperm.xlu0 %651, %v590_v53  }
  0xf3   : > { %v589_v56 = vld [vmem:[#allocation4] ss:$0 sm:$0xff] }
  0xf5   : > { %v383_v54 = vld [vmem:[#allocation2] sm:$0x1] }
  0xf6   : > { %v384_v55 = vsel %vm310_vm3, %v383_v54, 0.0 }
  0xf7   : > { %385 = vadd.xlane.f32.xlu1 %v384_v55 }
 0x108   : > { %400 = vperm.xlu1 %650, %v589_v56  }
 0x16f   : > { %v411_v61 = vpop.permute.xlu0 %410 }
 0x184   : > { %v386_v58 = vpop.xlane.xlu1 %385 }
 0x185   : > { %v417_v62 = vrot.slane %v386_v58, %v416_v59 }
 0x188   : > { %v401_v60 = vpop.permute.xlu1 %400 }
 0x189   : > { %v403_v63 = vsel %vm393_vm5, %v401_v60, 0.0 }
 0x18a   : > { %v413_v1 = vsel %vm392_vm6, %v411_v61, %v403_v63 }
 0x18b   : > { %v418_v2 = vsel %vm391_vm7, %v417_v62, %v413_v1 }
 0x18c   : > { %419 = vst [vmem:[%s293_s8] sm:$0xff] %v418_v2 }
 0x18d PF: > { %s18_s19 = sadd.s32 1, %s733_s19   ;;  %s894_s15 = smov %s721_s16 }
 0x18e   : > { %p15_p10 = scmp.ge.s32.totalorder %s18_s19, 4   ;;  %s871_s16 = smov 0  }
 0x18f   : > { %s895_s17 = smov %s729_s18  ;;  %s896_s18 = smov %s898_s21 }
 0x190   :  { %17 = sbr.rel (!%p15_p10) target bundleno = 4 (0x4), region = 103 }
 0x197   :  { %473 = vsyncpa [#allocation6], 1 }
 0x198   :  { %475 = vsyncpa [#allocation6 + $0x1], 1 }

// kernel: _process_mapping_loss_impl.3
= control target key start
LH: loop header
LB: loop body
LE: loop exit
PB: predicated region body
PF: predicated region fallthrough
CT: control target
= control target key end

     0   :  { %s427_s9 = smov 0   ;;  %s429_s10 = smov 0   ;;  %s476_s0 = inlined_call_operand.vmem [shape: f32[8,32], index: 0, kind: input, shape index: {}]   ;;  %s477_s1 = inlined_call_operand.vmem [shape: f32[8,32], index: 1, kind: input, shape index: {}]   ;;  %s478_s2 = inlined_call_operand.vmem [shape: f32[16,128], index: 2, kind: output, shape index: {}]  }
   0x1   :  { %s431_s11 = smov 0  }
   0x2 LB: > { %s24_s12 = sadd.s32 1, %s405_s10  ;;  %p345_p0 = scmp.ge.s32.totalorder %s409_s11, 1  ;;  %s409_s11 = sphi %s431_s11, %s12_s11   ;;  %s405_s10 = sphi %s429_s10, %s480_s10   ;;  %s401_s9 = sphi %s427_s9, %s479_s9  }
   0x3   : > { %p26_p1 = scmp.ge.s32.totalorder %s24_s12, 2  ;;  %p156_p2 = scmp.lt.s32.totalorder %s409_s11, 3 }
   0x5   : > { %s482_s12 = smov (%p26_p1, %s24_s12), 0  ;;  %p157_p3 = pnand %p345_p0, %p156_p2 }
   0x6   : > { %p187_p4 = scmp.lt.s32.totalorder (!%p157_p3), %s401_s9, 0  ;;  %s355_s13 = sshll.u32 (!%p157_p3), %s401_s9, 3  ;;  %v218_v0 = vlaneseq (!%p157_p3)  ;;  %vm226_vm1 = vcmask (!%p157_p3), 261120   ;;  %vm214_vm2 = vcmask (!%p157_p3), 253952   ;;  %v411_v12 = vmov (!%p157_p3), 0.0  }
   0x7   : > { %160 = sbr.rel (%p157_p3) target bundleno = 358 (0x166), region = 28  ;;  %v220_v1 = vstv (!%p157_p3), %s355_s13  ;;  %215 = vst.msk [vmem:[#allocation2] sm:$0x1] (!%p157_p3), %vm214_vm2, %v411_v12  ;;  %p206_p5 = scmp.lt.s32.totalorder (!%p157_p3), %s401_s9, 1 }
   0x8   : > { %v219_v2 = vshrl.u32 (!%p157_p3), %v218_v0, 7 }
   0xa   : > { %v221_v3 = vadd.s32 (!%p157_p3), %v220_v1, %v219_v2  ;;  %v264_v34 = vsub.s32 (!%p157_p3), 0, %v219_v2 }
   0xc   : > { %vm222_vm0 = vcmp.lt.s32.totalorder (!%p157_p3), %v221_v3, 8 }
   0xe   : > { %s188_s14 = scalar_select %p187_p4, %s401_s9, 0  ;;  %v243_v29 = vld [vmem:[#allocation2] sm:$0x1] }
   0xf   : > { %s486_s9 = smov (!%p206_p5, %s401_s9), 1 }
  0x10   : > { %s484_s14 = smov (!%p187_p4, %s188_s14), 0  ;;  %s354_s22 = sshll.u32 %s486_s9, 3 }
  0x11   : > { %s349_s15 = sshll.u32 %s484_s14, 3  ;;  %s209_s25 = scalar_lea.vmem %s478_s2, %s354_s22 }
  0x12   : > { %s192_s18 = scalar_lea.vmem %s476_s0, %s349_s15  ;;  %s202_s21 = scalar_lea.vmem %s477_s1, %s349_s15 }
  0x13   : > { %v223_v4 = vld [vmem:[%s192_s18] sm:$0xff] }
  0x14   : > { %v233_v5 = vld [vmem:[%s202_s21] sm:$0xff]  ;;  %v224_v6 = vsel %vm222_vm0, %v223_v4, 0.0 }
  0x15   : > { %v234_v7 = vsel %vm222_vm0, %v233_v5, 0.0  ;;  %v225_v8 = vmul.f32 %v224_v6, %v224_v6 }
  0x16   : > { %v235_v9 = vmul.f32 %v234_v7, %v234_v7 }
  0x17   : > { %v227_v10 = vsel %vm226_vm1, %v225_v8, 0.0 }
  0x18   : > { %228 = vadd.xlane.f32.xlu0 %v227_v10  ;;  %v236_v11 = vsel %vm226_vm1, %v235_v9, 0.0 }
  0x1c   : > { %237 = vadd.xlane.f32.xlu0 %v236_v11 }
  0xa5   : > { %v229_v13 = vpop.xlane.xlu0 %228 }
  0xa6   : > { %v230_v14 = vmax.f32 %v229_v13, 1e-24 }
  0xa8   : > { %383 = vrsqrt.f32 %v230_v14 }
  0xa9   : > { %v238_v15 = vpop.xlane.xlu0 %237 }
  0xaa   : > { %v239_v16 = vmax.f32 %v238_v15, 1e-24 }
  0xac   : > { %385 = vrsqrt.f32 %v239_v16 }
  0xb2   : > { %v384_v17 = vpop.eup %383 }
  0xb3   : > { %v232_v19 = vmul.f32 %v384_v17, %v224_v6 }
  0xb6   : > { %v386_v18 = vpop.eup %385 }
  0xb7   : > { %v241_v20 = vmul.f32 %v386_v18, %v234_v7 }
  0xb9   : > { %v242_v21 = vsub.f32 %v232_v19, %v241_v20 }
  0xbb   : > { %v244_v22 = vmul.f32 %v242_v21, %v242_v21 }
  0xbd   : > { %v245_v23 = vsel %vm226_vm1, %v244_v22, 0.0 }
  0xbe   : > { %v246_v24 = vrot.slane %v245_v23, 4 }
  0xc0   : > { %v247_v25 = vadd.f32 %v246_v24, %v245_v23 }
  0xc2   : > { %v248_v26 = vrot.slane %v247_v25, 2 }
  0xc4   : > { %v249_v27 = vadd.f32 %v248_v26, %v247_v25 }
  0xc6   : > { %v250_v28 = vrot.slane %v249_v27, 1 }
  0xc8   : > { %v251_v30 = vadd.f32 %v250_v28, %v249_v27 }
  0xca   : > { %v252_v31 = vadd.f32 %v251_v30, %v243_v29 }
  0xcc   : > { %254 = vst.msk [vmem:[#allocation2] sm:$0x1] %vm214_vm2, %v252_v31 }
  0xd3   : > { %v258_v32 = vld [vmem:[#allocation2] sm:$0x1] }
  0xd4   : > { %v259_v33 = vsel %vm214_vm2, %v258_v32, 0.0 }
  0xd5   : > { %260 = vadd.xlane.f32.xlu1 %v259_v33 }
 0x162   : > { %v261_v35 = vpop.xlane.xlu1 %260 }
 0x163   : > { %v265_v36 = vrot.slane %v261_v35, %v264_v34 }
 0x165   : > { %267 = vst [vmem:[%s209_s25] sm:$0xff] %v265_v36 }
 0x166 PF: > { %s12_s11 = sadd.s32 1, %s409_s11   ;;  %s479_s9 = smov %s405_s10 }
 0x167   : > { %p9_p6 = scmp.ge.s32.totalorder %s12_s11, 4   ;;  %s480_s10 = smov %s482_s12 }
 0x169   :  { %11 = sbr.rel (!%p9_p6) target bundleno = 2 (0x2), region = 69 }

// kernel: _process_mapping_loss_impl.5
= control target key start
LH: loop header
LB: loop body
LE: loop exit
PB: predicated region body
PF: predicated region fallthrough
CT: control target
= control target key end

     0   :  { %9 = vsyncpa [#allocation4], 0  ;;  %s239_s0 = inlined_call_operand.vmem [shape: f32[16,128], index: 0, kind: input, shape index: {}]   ;;  %s240_s1 = inlined_call_operand.vmem [shape: f32[16,128], index: 1, kind: input, shape index: {}]   ;;  %s241_s2 = inlined_call_operand.vmem [shape: f32[2,8], index: 2, kind: input, shape index: {}]   ;;  %s242_s3 = inlined_call_operand.vmem [shape: f32[2,8], index: 3, kind: input, shape index: {}]   ;;  %s243_s4 = inlined_call_operand.vmem [shape: f32[8,128], index: 4, kind: output, shape index: {}]  }
   0x1   :  { %s16_s17 = sshll.u32 %s239_s0, 4  ;;  %s17_s17 = int_to_ptr.vmem [resolvable:$true] %s16_s17 }
   0x2   :  { %10 = vsyncpa [#allocation6], 0  ;;  %s28_s20 = sshll.u32 %s240_s1, 4  ;;  %s165_s21 = scalar_lea.vmem %s17_s17, 256  ;;  %s29_s20 = int_to_ptr.vmem [resolvable:$true] %s28_s20 }
   0x3   :  { %p166_p0 = scmp.ne.s32.totalorder %s17_s17, %s165_s21  ;;  %p170_p1 = scmp.lt.s32.totalorder %s17_s17, %s17_s17 }
   0x4   :  { %p171_p2 = scmp.lt.s32.totalorder %s165_s21, %s165_s21 }
   0x6   :  { %p172_p3 = por %p171_p2, %p170_p1 }
   0x8   :  { %p173_p4 = pnand %p172_p3, %p166_p0 }
   0xa   :  { %176 = shalt.err (!%p173_p4)
}
   0xb   :  { %s193_s22 = smov [#allocation3]   ;;  %s194_s23 = smov 128  }
   0xc   :  { %s195_s24 = smov 8   ;;  %s177_s25 = scalar_lea.vmem %s29_s20, 256 }
   0xd   :  { %22 = dma.vmem_to_smem %s17_s17, 256, %s193_s22, [#allocation4], %s194_s23, %s194_s23, %s195_s24  }
   0xe   :  { %p178_p5 = scmp.ne.s32.totalorder %s29_s20, %s177_s25  ;;  %p182_p6 = scmp.lt.s32.totalorder %s29_s20, %s29_s20 }
   0xf   :  { %p183_p7 = scmp.lt.s32.totalorder %s177_s25, %s177_s25 }
  0x11   :  { %p184_p8 = por %p183_p7, %p182_p6 }
  0x13   :  { %p185_p9 = pnand %p184_p8, %p178_p5 }
  0x15   :  { %188 = shalt.err (!%p185_p9)
}
  0x16   :  { %s196_s0 = smov [#allocation5]  }
  0x17   :  { %34 = dma.vmem_to_smem %s29_s20, 256, %s196_s0, [#allocation6], %s194_s23, %s194_s23, %s195_s24  }
  0x18   :  { %189 = dma.done.wait [#allocation4], 256  }
  0x19   :  { %190 = vsyncadd [#allocation4], 4294967040 }
  0x1a   :  { %191 = dma.done.wait [#allocation6], 256  }
  0x1b   :  { %192 = vsyncadd [#allocation6], 4294967040 }
  0x1c   :  { %45 = sfence }
  0x1d   :  { %s143_s1 = sld [smem:[#allocation5 + $0x1]]  ;;  %s145_s27 = sld [smem:[#allocation5 + $0x2]]  ;;  %v66_v4 = vlaneseq  ;;  %v71_v5 = vld [vmem:[%s241_s2] sm:$0x3]  ;;  %vm82_vm1 = vcmask 58368  }
  0x1e   :  { %s144_s26 = sld [smem:[#allocation5 + $0x401]]  ;;  %s146_s28 = sld [smem:[#allocation5 + $0x402]]  ;;  %v74_v6 = vld [vmem:[%s242_s3] sm:$0x3] }
  0x1f   :  { %s197_s5 = smov 1e-24   ;;  %v67_v10 = vshrl.u32 %v66_v4, 7  ;;  %s102_s2 = sld [smem:[#allocation5]]  ;;  %v123_v23 = vand.u32 127, %v66_v4 }
  0x20   :  { %s148_s3 = sld [smem:[#allocation5 + $0x400]]  ;;  %s198_s20 = smov 10.0  }
  0x21   :  { %vm79_vm0 = vcmp.lt.s32.totalorder %v67_v10, 2  ;;  %s99_s14 = sld [smem:[#allocation3]]  ;;  %vm127_vm2 = vcmp.eq.s32.totalorder %v123_v23, 3  ;;  %vm126_vm3 = vcmp.eq.s32.totalorder %v123_v23, 2  ;;  %vm125_vm4 = vcmp.eq.s32.totalorder %v123_v23, 1 }
  0x22   :  { %s147_s15 = sld [smem:[#allocation3 + $0x400]]  ;;  %vm124_vm5 = vcmp.eq.s32.totalorder %v123_v23, 0 }
  0x24   :  { %s54_s29 = sadd.f32 %s144_s26, %s143_s1 }
  0x25   :  { %s57_s30 = sadd.f32 %s146_s28, %s145_s27 }
  0x26   :  { %s58_s6 = smax.f32 %s197_s5, %s54_s29  ;;  %s104_s16 = sadd.f32 %s148_s3, %s102_s2 }
  0x27   :  { %v59_v0 = vstv %s58_s6  ;;  %s62_s7 = smax.f32 %s197_s5, %s57_s30 }
  0x28   :  { %161 = vrsqrt.f32 %v59_v0  ;;  %v63_v1 = vstv %s62_s7  ;;  %s101_s17 = sadd.f32 %s147_s15, %s99_s14  ;;  %s111_s18 = smul.f32 0.00390625, %s104_s16 }
  0x29   :  { %163 = vrsqrt.f32 %v63_v1 }
  0x2a   :  { %s107_s19 = smul.f32 0.00390625, %s101_s17  ;;  %s112_s21 = smin.f32 %s198_s20, %s111_s18 }
  0x2b   :  { %s118_s22 = smul.f32 0.5, %s112_s21  ;;  %v132_v25 = vstv %s112_s21 }
  0x2c   :  { %s108_s23 = smin.f32 %s198_s20, %s107_s19 }
  0x2d   :  { %s119_s0 = sadd.f32 %s118_s22, %s108_s23  ;;  %v134_v28 = vstv %s108_s23 }
  0x32   :  { %v162_v2 = vpop.eup %161 }
  0x33   :  { %v164_v3 = vpop.eup %163  ;;  %149 = vpush %v162_v2 }
  0x34   :  { %151 = vpush %v164_v3 }
  0x64   :  { %s150_s10 = spop %149 }
  0x65   :  { %v72_v7 = vstv %s150_s10  ;;  %s152_s13 = spop %151 }
  0x66   :  { %v73_v8 = vmul.f32 %v72_v7, %v71_v5  ;;  %v75_v9 = vstv %s152_s13 }
  0x67   :  { %v76_v11 = vmul.f32 %v75_v9, %v74_v6 }
  0x69   :  { %v77_v12 = vsub.f32 %v73_v8, %v76_v11 }
  0x6b   :  { %v78_v13 = vand.u32 2147483647, %v77_v12 }
  0x6d   :  { %v80_v14 = vsel %vm79_vm0, %v78_v13, 0.0 }
  0x6e   :  { %v83_v15 = vsel %vm82_vm1, %v80_v14, 0.0 }
  0x6f   :  { %84 = vadd.xlane.f32.xlu0 %v83_v15 }
  0xfc   :  { %v85_v16 = vpop.xlane.xlu0 %84 }
  0xfd   :  { %v86_v17 = vrot.slane %v85_v16, 4 }
  0xff   :  { %v87_v18 = vadd.f32 %v86_v17, %v85_v16 }
 0x101   :  { %v88_v19 = vrot.slane %v87_v18, 2 }
 0x103   :  { %v89_v20 = vadd.f32 %v88_v19, %v87_v18 }
 0x105   :  { %v90_v21 = vrot.slane %v89_v20, 1 }
 0x107   :  { %v91_v22 = vadd.f32 %v90_v21, %v89_v20 }
 0x109   :  { %153 = vpush %v91_v22 }
 0x13a   :  { %s154_s24 = spop %153 }
 0x13b   :  { %s116_s25 = smul.f32 0.125, %s154_s24 }
 0x13d   :  { %s117_s1 = smin.f32 %s198_s20, %s116_s25 }
 0x13e   :  { %s120_s26 = smul.f32 0.1, %s117_s1  ;;  %v130_v27 = vstv %s117_s1 }
 0x140   :  { %s121_s27 = sadd.f32 %s120_s26, %s119_s0 }
 0x142   :  { %v128_v24 = vstv %s121_s27 }
 0x143   :  { %v129_v26 = vsel %vm127_vm2, %v128_v24, 0.0 }
 0x144   :  { %v131_v29 = vsel %vm126_vm3, %v130_v27, %v129_v26 }
 0x145   :  { %v133_v30 = vsel %vm125_vm4, %v132_v25, %v131_v29 }
 0x146   :  { %v135_v31 = vsel %vm124_vm5, %v134_v28, %v133_v30 }
 0x147   :  { %136 = vst [vmem:[%s243_s4] sm:$0xff] %v135_v31 }
 0x148   :  { %141 = vsyncpa [#allocation4], 1 }
 0x149   :  { %142 = vsyncpa [#allocation6], 1 }

</bundles_post_ra>
